<compile_context>
chip_gen: v5e
topology: v5e:2x2
jax: 0.10.0
libtpu: 0.0.40
codegen_flags: <defaults>
</compile_context>

<pallas_src>
import jax
import jax.numpy as jnp
from jax.experimental import pallas as pl
from jax.experimental.pallas import tpu as pltpu

EPS = 1e-5


# ----------------------------------------------------------------------------
# Fused Pallas kernel: deconv(one lane-dense matmul)+BN+ReLU+residual
#                      -> 3x3 conv as ONE im2col matmul+BN+ReLU -> dense store
# ----------------------------------------------------------------------------
def _make_fuseup_kernel(h, wc4, wco4):
    def kernel(aup_ref, fa_ref, wa_ref, ush_ref, wb_ref, csh_ref, o_ref):
        # ---- stage A: transposed conv as one lane-dense matmul (BN scale
        #      folded into wa columns) + shift + ReLU + residual add. ---------
        e = jnp.dot(aup_ref[0], wa_ref[...],
                    preferred_element_type=jnp.float32)              # (h, wc4)
        fused = jnp.maximum(e + ush_ref[...], 0.0) + fa_ref[0]       # (h, wc4)

        # ---- stage B: 3x3 conv as ONE im2col matmul.  Horizontal taps and
        #      the left/right zero border live in the block-banded weight;
        #      vertical taps are sublane shifts of the register tile. ---------
        zrow = jnp.zeros((1, wc4), jnp.float32)
        vprev = jnp.concatenate([zrow, fused[:h - 1, :]], axis=0)    # row y-1
        vnext = jnp.concatenate([fused[1:, :], zrow], axis=0)        # row y+1
        patches = jnp.concatenate([vprev, fused, vnext], axis=1)     # (h, 3*wc4)

        out = jnp.dot(patches, wb_ref[...],
                      preferred_element_type=jnp.float32)            # (h, wco4)
        out = jnp.maximum(out + csh_ref[...], 0.0)
        o_ref[0] = out.astype(o_ref.dtype)                           # dense vst

    return kernel


def fuse_up_forward(folded, x_fa_nchw, x_up_nchw):
    N, cin, H, W = x_fa_nchw.shape
    h, w = H // 2, W // 2
    c4 = 4 * cin
    wc4 = w * c4
    wco4 = folded["wrow"].shape[-1]
    cout = wco4 // (4 * w)

    # ---- XLA glue: lane-dense packed inputs (last dim = w*4*Cin = 128). -----
    xu = jnp.transpose(x_up_nchw, (0, 2, 3, 1))                      # (N,h,w,Cin)
    xu = jnp.pad(xu, ((0, 0), (0, 1), (0, 1), (0, 0)))               # +1 bottom/right
    a_up = jnp.concatenate(
        [xu[:, sy:sy + h, sx:sx + w, :] for sy in (0, 1) for sx in (0, 1)],
        axis=-1).reshape(N, h, wc4)

    fa = x_fa_nchw.reshape(N, cin, h, 2, w, 2)
    fa = jnp.transpose(fa, (0, 2, 4, 3, 5, 1)).reshape(N, h, wc4)

    kernel = _make_fuseup_kernel(h, wc4, wco4)

    flops = int(N * (2 * h * wc4 * wc4 + 2 * h * (3 * wc4) * wco4))
    bytes_accessed = int(4 * (a_up.size + fa.size + N * h * wco4
                              + folded["wa"].size + folded["wrow"].size
                              + folded["up_shift"].size
                              + folded["conv_shift"].size))

    out2d = pl.pallas_call(
        kernel,
        out_shape=jax.ShapeDtypeStruct((N, h, wco4), jnp.float32),
        grid_spec=pltpu.PrefetchScalarGridSpec(
            num_scalar_prefetch=0,
            grid=(N,),
            in_specs=[
                pl.BlockSpec((1, h, wc4), lambda b: (b, 0, 0)),       # a_up
                pl.BlockSpec((1, h, wc4), lambda b: (b, 0, 0)),       # residual
                # grid-invariant operands (constant index_map -> fetched once)
                pl.BlockSpec((wc4, wc4), lambda b: (0, 0)),           # WA (block-diag)
                pl.BlockSpec((1, wc4), lambda b: (0, 0)),             # up shift
                pl.BlockSpec((3 * wc4, wco4), lambda b: (0, 0)),      # WROW (banded)
                pl.BlockSpec((1, wco4), lambda b: (0, 0)),            # conv shift
            ],
            out_specs=pl.BlockSpec((1, h, wco4), lambda b: (b, 0, 0)),
        ),
        compiler_params=pltpu.CompilerParams(
            dimension_semantics=("parallel",)),
        cost_estimate=pl.CostEstimate(flops=flops, transcendentals=0,
                                      bytes_accessed=bytes_accessed),
    )(a_up, fa, folded["wa"], folded["up_shift"],
      folded["wrow"], folded["conv_shift"])

    # ---- XLA glue: de-interleave the parity/width-packed output to NCHW. ----
    out = out2d.reshape(N, h, w, 2, 2, cout)
    out = jnp.transpose(out, (0, 5, 1, 3, 2, 4)).reshape(N, cout, H, W)
    return out


# ----------------------------------------------------------------------------
# Parameter setup (deterministic, synthetic) + weight / BN folding glue.
# ----------------------------------------------------------------------------
def init_params(key, in_ch, out_ch):
    ks = jax.random.split(key, 11)
    p = {}
    # DeConvBNAct: ConvTranspose2d(in,in,3,stride=2,pad=1,out_pad=1), bias; BN(in)
    p["deconv_w"] = 0.1 * jax.random.normal(ks[0], (in_ch, in_ch, 3, 3), jnp.float32)
    p["deconv_b"] = 0.1 * jax.random.normal(ks[1], (in_ch,), jnp.float32)
    p["up_gamma"] = 1.0 + 0.1 * jax.random.normal(ks[2], (in_ch,), jnp.float32)
    p["up_beta"] = 0.1 * jax.random.normal(ks[3], (in_ch,), jnp.float32)
    p["up_mean"] = 0.1 * jax.random.normal(ks[4], (in_ch,), jnp.float32)
    p["up_var"] = 1.0 + 0.1 * jnp.abs(jax.random.normal(ks[5], (in_ch,), jnp.float32))
    # ConvBNAct: Conv2d(in,out,3,pad=1,bias=False); BN(out)
    p["conv_w"] = 0.1 * jax.random.normal(ks[6], (out_ch, in_ch, 3, 3), jnp.float32)
    p["conv_gamma"] = 1.0 + 0.1 * jax.random.normal(ks[7], (out_ch,), jnp.float32)
    p["conv_beta"] = 0.1 * jax.random.normal(ks[8], (out_ch,), jnp.float32)
    p["conv_mean"] = 0.1 * jax.random.normal(ks[9], (out_ch,), jnp.float32)
    p["conv_var"] = 1.0 + 0.1 * jnp.abs(jax.random.normal(ks[10], (out_ch,), jnp.float32))
    return p


def fold_params(p, w):
    """Build lane-dense matmul weights with BN scales folded in.

    w is the half-resolution width (output lane packing is width-major)."""
    cin = p["deconv_w"].shape[0]
    cout = p["conv_w"].shape[0]
    c4, co4 = 4 * cin, 4 * cout
    f = {}

    # -- stage A: ConvTranspose2d as a parity-packed matmul (compact 4Cin x 4Cin)
    # conv-equivalent (spatially flipped, io-swapped) taps: wf[k,l][ci,co]
    wf = jnp.transpose(p["deconv_w"][:, :, ::-1, ::-1], (2, 3, 0, 1))
    zero_cc = jnp.zeros((cin, cin), jnp.float32)
    rows = []
    for sy in (0, 1):                       # input-slice parity (row, col)
        for sx in (0, 1):
            cols = []
            for dy in (0, 1):               # output parity plane (row, col)
                for dx in (0, 1):
                    k, l = 2 * sy + 1 - dy, 2 * sx + 1 - dx
                    cols.append(wf[k, l] if (k <= 2 and l <= 2) else zero_cc)
            rows.append(jnp.concatenate(cols, axis=1))
    wa = jnp.concatenate(rows, axis=0)                        # (4Cin, 4Cin)

    up_scale = p["up_gamma"] / jnp.sqrt(p["up_var"] + EPS)
    up_shift = p["up_beta"] + up_scale * (p["deconv_b"] - p["up_mean"])
    up_scale4 = jnp.tile(up_scale, 4)[None, :]                # (1, 4Cin)
    up_shift4 = jnp.tile(up_shift, 4)[None, :]
    wa = wa * up_scale4                                       # fold BN scale

    # lane-dense block-diagonal expansion: one (w*4Cin, w*4Cin) matmul weight
    f["wa"] = jnp.kron(jnp.eye(w, dtype=jnp.float32), wa)
    f["up_shift"] = jnp.tile(up_shift4, (1, w))               # (1, w*4Cin)

    # -- stage B: 3x3 conv re-expressed over the parity-packed planes --------
    zero_co = jnp.zeros((cin, cout), jnp.float32)
    slices = []
    for rs in range(3):                     # input row/col offset (rs,cs)
        for cs in range(3):
            rblocks = []
            for ra in (0, 1):               # stored plane parity (row, col)
                for rb in (0, 1):
                    cblocks = []
                    for ay in (0, 1):       # output parity plane (row, col)
                        for bx in (0, 1):
                            kh = 2 * rs - ay + ra - 1
                            kw = 2 * cs - bx + rb - 1
                            if 0 <= kh <= 2 and 0 <= kw <= 2:
                                cblocks.append(
                                    jnp.transpose(p["conv_w"][:, :, kh, kw]))
                            else:
                                cblocks.append(zero_co)
                    rblocks.append(jnp.concatenate(cblocks, axis=1))
            slices.append(jnp.concatenate(rblocks, axis=0))
    wb9 = jnp.stack(slices, axis=0)                           # (9, 4Cin, 4Cout)

    c_scale = p["conv_gamma"] / jnp.sqrt(p["conv_var"] + EPS)
    c_shift = p["conv_beta"] - c_scale * p["conv_mean"]
    conv_scale4 = jnp.tile(c_scale, 4)[None, :]               # (1, 4Cout)
    wb9 = wb9 * conv_scale4                                   # fold BN scale

    # block-banded lane-dense expansion: horizontal taps + left/right zero
    # border live in the weight; rows 0..wc4-1 pair with the row-(y-1) shift,
    # the next wc4 with the unshifted row, the last wc4 with row (y+1).
    bands = []
    for rs in range(3):
        band = jnp.zeros((w * c4, w * co4), jnp.float32)
        for cs in range(3):
            band = band + jnp.kron(
                jnp.eye(w, k=1 - cs, dtype=jnp.float32), wb9[rs * 3 + cs])
        bands.append(band)
    f["wrow"] = jnp.concatenate(bands, axis=0)                # (3*w*4Cin, w*4Cout)
    f["conv_shift"] = jnp.tile(jnp.tile(c_shift, 4)[None, :], (1, w))  # (1, w*4Cout)
    return f


# ----------------------------------------------------------------------------
# Pure-JAX reference (mirrors the PyTorch module) for a correctness check.
# ----------------------------------------------------------------------------
def reference_forward(p, x_fa, x_up):
    dn = ("NCHW", "OIHW", "NCHW")
    wt = jnp.transpose(p["deconv_w"][:, :, ::-1, ::-1], (1, 0, 2, 3))
    y = jax.lax.conv_general_dilated(x_up, wt, window_strides=(1, 1),
                                     padding=[(1, 2), (1, 2)],
                                     lhs_dilation=(2, 2), dimension_numbers=dn)
    y = y + p["deconv_b"][None, :, None, None]
    y = (p["up_gamma"][None, :, None, None]
         * (y - p["up_mean"][None, :, None, None])
         / jnp.sqrt(p["up_var"] + EPS)[None, :, None, None]
         + p["up_beta"][None, :, None, None])
    y = jnp.maximum(y, 0.0)
    z = x_fa + y
    o = jax.lax.conv_general_dilated(z, p["conv_w"], (1, 1),
                                     [(1, 1), (1, 1)], dimension_numbers=dn)
    o = (p["conv_gamma"][None, :, None, None]
         * (o - p["conv_mean"][None, :, None, None])
         / jnp.sqrt(p["conv_var"] + EPS)[None, :, None, None]
         + p["conv_beta"][None, :, None, None])
    return jnp.maximum(o, 0.0)


if __name__ == "__main__":
    in_channels, out_channels = 4, 8
    N, H, W = 2, 16, 16

    key = jax.random.PRNGKey(0)
    k_fa, k_up, k_p = jax.random.split(key, 3)
    x_fa = jax.random.normal(k_fa, (N, in_channels, H, W), jnp.float32)        # NCHW
    x_up = jax.random.normal(k_up, (N, in_channels, H // 2, W // 2), jnp.float32)

    params = init_params(k_p, in_channels, out_channels)
    folded = fold_params(params, W // 2)

    fwd = jax.jit(fuse_up_forward)
    out = jax.block_until_ready(fwd(folded, x_fa, x_up))

    ref = jax.block_until_ready(reference_forward(params, x_fa, x_up))
    assert out.shape == (N, out_channels, H, W), out.shape
    assert jnp.allclose(out, ref, atol=1e-4, rtol=1e-4), \
        float(jnp.max(jnp.abs(out - ref)))

    print("KERNEL_OK")
</pallas_src>

<mosaic_0001>
module attributes {stable_mosaic.version = 11 : i64} {
  func.func @kernel(%arg0: i32, %arg1: memref<1x8x128xf32, #tpu.memory_space<vmem>>, %arg2: memref<1x8x128xf32, #tpu.memory_space<vmem>>, %arg3: memref<128x128xf32, #tpu.memory_space<vmem>>, %arg4: memref<1x128xf32, #tpu.memory_space<vmem>>, %arg5: memref<384x256xf32, #tpu.memory_space<vmem>>, %arg6: memref<1x256xf32, #tpu.memory_space<vmem>>, %arg7: memref<1x8x256xf32, #tpu.memory_space<vmem>>) attributes {dimension_semantics = [#tpu.dimension_semantics<parallel>], iteration_bounds = array<i64: 2>, scalar_prefetch = 0 : i64, scratch_operands = 0 : i64, tpu.core_type = #tpu.core_type<tc>, window_params = [{transform_indices = @transform_0, window_bounds = array<i64: 1, 8, 128>}, {transform_indices = @transform_1, window_bounds = array<i64: 1, 8, 128>}, {pipeline_mode = #tpu.pipeline_mode<synchronous>, transform_indices = @transform_2, window_bounds = array<i64: 128, 128>}, {pipeline_mode = #tpu.pipeline_mode<synchronous>, transform_indices = @transform_3, window_bounds = array<i64: 1, 128>}, {pipeline_mode = #tpu.pipeline_mode<synchronous>, transform_indices = @transform_4, window_bounds = array<i64: 384, 256>}, {pipeline_mode = #tpu.pipeline_mode<synchronous>, transform_indices = @transform_5, window_bounds = array<i64: 1, 256>}, {transform_indices = @transform_6, window_bounds = array<i64: 1, 8, 256>}]} {
    %c0 = arith.constant 0 : index
    %c0_0 = arith.constant 0 : index
    %c0_1 = arith.constant 0 : index
    %0 = vector.load %arg1[%c0, %c0_0, %c0_1] : memref<1x8x128xf32, #tpu.memory_space<vmem>>, vector<1x8x128xf32>
    %1 = vector.shape_cast %0 : vector<1x8x128xf32> to vector<8x128xf32>
    %c0_2 = arith.constant 0 : index
    %c0_3 = arith.constant 0 : index
    %2 = vector.load %arg3[%c0_2, %c0_3] : memref<128x128xf32, #tpu.memory_space<vmem>>, vector<128x128xf32>
    %cst = arith.constant dense<0.000000e+00> : vector<8x128xf32>
    %3 = tpu.matmul %1, %2, %cst {dimension_numbers = #tpu.dot_dimension_numbers<[1], [0], [0], [1], [0, 0, 1, 1], [], []>} : vector<8x128xf32>, vector<128x128xf32>, vector<8x128xf32> -> vector<8x128xf32>
    %c0_4 = arith.constant 0 : index
    %c0_5 = arith.constant 0 : index
    %4 = vector.load %arg4[%c0_4, %c0_5] : memref<1x128xf32, #tpu.memory_space<vmem>>, vector<1x128xf32>
    %5 = vector.broadcast %4 : vector<1x128xf32> to vector<8x128xf32>
    %6 = arith.addf %3, %5 : vector<8x128xf32>
    %cst_6 = arith.constant 0.000000e+00 : f32
    %7 = vector.broadcast %cst_6 : f32 to vector<8x128xf32>
    %8 = arith.maximumf %6, %7 : vector<8x128xf32>
    %c0_7 = arith.constant 0 : index
    %c0_8 = arith.constant 0 : index
    %c0_9 = arith.constant 0 : index
    %9 = vector.load %arg2[%c0_7, %c0_8, %c0_9] : memref<1x8x128xf32, #tpu.memory_space<vmem>>, vector<1x8x128xf32>
    %10 = vector.shape_cast %9 : vector<1x8x128xf32> to vector<8x128xf32>
    %11 = arith.addf %8, %10 : vector<8x128xf32>
    %cst_10 = arith.constant 0.000000e+00 : f32
    %12 = vector.broadcast %cst_10 : f32 to vector<1x128xf32>
    %13 = vector.extract_strided_slice %11 {offsets = [0, 0], sizes = [7, 128], strides = [1, 1]} : vector<8x128xf32> to vector<7x128xf32>
    %14 = tpu.concatenate %12, %13 in 0 : vector<1x128xf32>, vector<7x128xf32> -> vector<8x128xf32>
    %15 = vector.extract_strided_slice %11 {offsets = [1, 0], sizes = [7, 128], strides = [1, 1]} : vector<8x128xf32> to vector<7x128xf32>
    %16 = tpu.concatenate %15, %12 in 0 : vector<7x128xf32>, vector<1x128xf32> -> vector<8x128xf32>
    %17 = tpu.concatenate %14, %11, %16 in 1 : vector<8x128xf32>, vector<8x128xf32>, vector<8x128xf32> -> vector<8x384xf32>
    %c0_11 = arith.constant 0 : index
    %c0_12 = arith.constant 0 : index
    %18 = vector.load %arg5[%c0_11, %c0_12] : memref<384x256xf32, #tpu.memory_space<vmem>>, vector<384x256xf32>
    %cst_13 = arith.constant dense<0.000000e+00> : vector<8x256xf32>
    %19 = tpu.matmul %17, %18, %cst_13 {dimension_numbers = #tpu.dot_dimension_numbers<[1], [0], [0], [1], [0, 0, 1, 1], [], []>} : vector<8x384xf32>, vector<384x256xf32>, vector<8x256xf32> -> vector<8x256xf32>
    %c0_14 = arith.constant 0 : index
    %c0_15 = arith.constant 0 : index
    %20 = vector.load %arg6[%c0_14, %c0_15] : memref<1x256xf32, #tpu.memory_space<vmem>>, vector<1x256xf32>
    %21 = vector.broadcast %20 : vector<1x256xf32> to vector<8x256xf32>
    %22 = arith.addf %19, %21 : vector<8x256xf32>
    %cst_16 = arith.constant 0.000000e+00 : f32
    %23 = vector.broadcast %cst_16 : f32 to vector<8x256xf32>
    %24 = arith.maximumf %22, %23 : vector<8x256xf32>
    %c0_17 = arith.constant 0 : index
    %c0_18 = arith.constant 0 : index
    %c0_19 = arith.constant 0 : index
    %25 = vector.load %arg7[%c0_17, %c0_18, %c0_19] : memref<1x8x256xf32, #tpu.memory_space<vmem>>, vector<1x8x256xf32>
    %26 = vector.shape_cast %25 : vector<1x8x256xf32> to vector<8x256xf32>
    %27 = vector.shape_cast %24 : vector<8x256xf32> to vector<1x8x256xf32>
    tpu.vector_store %arg7[%c0_17, %c0_18, %c0_19], %27 {strides = array<i32>} : memref<1x8x256xf32, #tpu.memory_space<vmem>>, vector<1x8x256xf32>,
    return
  }
  func.func @transform_0(%arg0: i32) -> (i32, i32, i32) {
    %c0_i32 = arith.constant 0 : i32
    %c0_i32_0 = arith.constant 0 : i32
    %c0_i32_1 = arith.constant 0 : i32
    return %arg0, %c0_i32, %c0_i32_0 : i32, i32, i32
  }
  func.func @transform_1(%arg0: i32) -> (i32, i32, i32) {
    %c0_i32 = arith.constant 0 : i32
    %c0_i32_0 = arith.constant 0 : i32
    %c0_i32_1 = arith.constant 0 : i32
    return %arg0, %c0_i32, %c0_i32_0 : i32, i32, i32
  }
  func.func @transform_2(%arg0: i32) -> (i32, i32) {
    %c0_i32 = arith.constant 0 : i32
    %c0_i32_0 = arith.constant 0 : i32
    %c0_i32_1 = arith.constant 0 : i32
    return %c0_i32, %c0_i32_0 : i32, i32
  }
  func.func @transform_3(%arg0: i32) -> (i32, i32) {
    %c0_i32 = arith.constant 0 : i32
    %c0_i32_0 = arith.constant 0 : i32
    %c0_i32_1 = arith.constant 0 : i32
    return %c0_i32, %c0_i32_0 : i32, i32
  }
  func.func @transform_4(%arg0: i32) -> (i32, i32) {
    %c0_i32 = arith.constant 0 : i32
    %c0_i32_0 = arith.constant 0 : i32
    %c0_i32_1 = arith.constant 0 : i32
    return %c0_i32, %c0_i32_0 : i32, i32
  }
  func.func @transform_5(%arg0: i32) -> (i32, i32) {
    %c0_i32 = arith.constant 0 : i32
    %c0_i32_0 = arith.constant 0 : i32
    %c0_i32_1 = arith.constant 0 : i32
    return %c0_i32, %c0_i32_0 : i32, i32
  }
  func.func @transform_6(%arg0: i32) -> (i32, i32, i32) {
    %c0_i32 = arith.constant 0 : i32
    %c0_i32_0 = arith.constant 0 : i32
    %c0_i32_1 = arith.constant 0 : i32
    return %arg0, %c0_i32, %c0_i32_0 : i32, i32, i32
  }
}

</mosaic_0001>

<bundles_post_ra>
// kernel: fuse_up_forward.1
= control target key start
LH: loop header
LB: loop body
LE: loop exit
PB: predicated region body
PF: predicated region fallthrough
CT: control target
= control target key end

     0   :  { %s682_s21 = smov 0   ;;  %s1062_s0 = inlined_call_operand.vmem [shape: f32[2,8,128], index: 0, kind: input, shape index: {}]   ;;  %s1063_s1 = inlined_call_operand.vmem [shape: f32[2,8,128], index: 1, kind: input, shape index: {}]   ;;  %s1064_s2 = inlined_call_operand.vmem [shape: f32[128,128], index: 2, kind: input, shape index: {}]   ;;  %s1065_s3 = inlined_call_operand.vmem [shape: f32[1,128], index: 3, kind: input, shape index: {}]   ;;  %s1066_s4 = inlined_call_operand.vmem [shape: f32[384,256], index: 4, kind: input, shape index: {}]   ;;  %s1067_s5 = inlined_call_operand.vmem [shape: f32[1,256], index: 5, kind: input, shape index: {}]   ;;  %s1068_s6 = inlined_call_operand.vmem [shape: f32[2,8,256], index: 6, kind: output, shape index: {}]  }
   0x1 LB: > { %s612_s22 = sadd.s32 4294967295, %s645_s21   ;;  %p616_p0 = scmp.ge.s32.totalorder %s645_s21, 1  ;;  %s645_s21 = sphi %s682_s21, %s16_s21  }
   0x2   : > { %p220_p1 = scmp.lt.s32.totalorder %s645_s21, 3 }
   0x4   : > { %p221_p2 = pnand %p616_p0, %p220_p1 }
   0x5   : > { %p758_p3 = scmp.lt.s32.totalorder (!%p221_p2), %s612_s22, 1 }
   0x6   : > { %224 = sbr.rel (%p221_p2) target bundleno = 320 (0x140), region = 44 }
   0xb   : > { %v282_v0 = vld [vmem:[%s1064_s2 + $0x78] sm:$0xff]  ;;  %v281_v1 = vld [vmem:[%s1064_s2 + $0x70] sm:$0xff]  ;;  %v280_v2 = vld [vmem:[%s1064_s2 + $0x68] sm:$0xff]  ;;  %s1071_s22 = smov (!%p758_p3, %s612_s22), 1  ;;  %vm313_vm0 = vcmask 1040384   ;;  %vm317_vm2 = vcmask 1046528  }
   0xc   : > { %287 = vmatpush.msra.mxu0 %v282_v0  ;;  %v279_v3 = vld [vmem:[%s1064_s2 + $0x60] sm:$0xff]  ;;  %v381_v4 = vld [vmem:[%s1066_s4 + $0x1f0] sm:$0xff]  ;;  %v278_v6 = vld [vmem:[%s1064_s2 + $0x58] sm:$0xff]  ;;  %s617_s12 = sshll.u32 %s1071_s22, 3 }
   0xd   : > { %v349_v5 = vld [vmem:[%s1066_s4 + $0xf0] sm:$0xff]  ;;  %441 = vmatpush.msra.mxu2 %v381_v4  ;;  %v379_v7 = vld [vmem:[%s1066_s4 + $0x1e0] sm:$0xff]  ;;  %v276_v14 = vld [vmem:[%s1064_s2 + $0x48] sm:$0xff]  ;;  %s256_s7 = scalar_lea.vmem %s1062_s0, %s617_s12  ;;  %s260_s19 = scalar_lea.vmem %s1063_s1, %s617_s12 }
   0xe   : > { %288 = vmatpush.msra.mxu0 %v281_v1  ;;  %421 = vmatpush.msra.mxu1 %v349_v5  ;;  %v347_v8 = vld [vmem:[%s1066_s4 + $0xe0] sm:$0xff]  ;;  %v377_v9 = vld [vmem:[%s1066_s4 + $0x1d0] sm:$0xff]  ;;  %v274_v20 = vld [vmem:[%s1064_s2 + $0x38] sm:$0xff]  ;;  %s629_s12 = sshll.u32 %s1071_s22, 4 }
   0xf   : > { %v345_v10 = vld [vmem:[%s1066_s4 + $0xd0] sm:$0xff]  ;;  %442 = vmatpush.msra.mxu2 %v379_v7  ;;  %v375_v12 = vld [vmem:[%s1066_s4 + $0x1c0] sm:$0xff]  ;;  %v272_v29 = vld [vmem:[%s1064_s2 + $0x28] sm:$0xff]  ;;  %s265_s27 = scalar_lea.vmem %s1068_s6, %s629_s12 }
  0x10   : > { %289 = vmatpush.msra.mxu0 %v280_v2  ;;  %v277_v11 = vld [vmem:[%s1064_s2 + $0x50] sm:$0xff]  ;;  %422 = vmatpush.msra.mxu1 %v347_v8  ;;  %v343_v13 = vld [vmem:[%s1066_s4 + $0xc0] sm:$0xff]  ;;  %v270_v37 = vld [vmem:[%s1064_s2 + $0x18] sm:$0xff] }
  0x11   : > { %443 = vmatpush.msra.mxu2 %v377_v9  ;;  %v373_v15 = vld [vmem:[%s1066_s4 + $0x1b0] sm:$0xff]  ;;  %v275_v17 = vld [vmem:[%s1064_s2 + $0x40] sm:$0xff]  ;;  %v268_v45 = vld [vmem:[%s1064_s2 + $0x8] sm:$0xff] }
  0x12   : > { %290 = vmatpush.msra.mxu0 %v279_v3  ;;  %423 = vmatpush.msra.mxu1 %v345_v10  ;;  %v341_v16 = vld [vmem:[%s1066_s4 + $0xb0] sm:$0xff]  ;;  %v371_v18 = vld [vmem:[%s1066_s4 + $0x1a0] sm:$0xff]  ;;  %v350_v53 = vld [vmem:[%s1066_s4 + $0xf8] sm:$0xff] }
  0x13   : > { %444 = vmatpush.msra.mxu2 %v375_v12  ;;  %v339_v19 = vld [vmem:[%s1066_s4 + $0xa0] sm:$0xff]  ;;  %v413_v21 = vld [vmem:[%s1066_s4 + $0x2f0] sm:$0xff]  ;;  %v348_v57 = vld [vmem:[%s1066_s4 + $0xe8] sm:$0xff] }
  0x14   : > { %291 = vmatpush.msra.mxu0 %v278_v6  ;;  %424 = vmatpush.msra.mxu1 %v343_v13  ;;  %v369_v22 = vld [vmem:[%s1066_s4 + $0x190] sm:$0xff]  ;;  %v411_v24 = vld [vmem:[%s1066_s4 + $0x2e0] sm:$0xff]  ;;  %v346_v61 = vld [vmem:[%s1066_s4 + $0xd8] sm:$0xff] }
  0x15   : > { %445 = vmatpush.msra.mxu2 %v373_v15  ;;  %v337_v23 = vld [vmem:[%s1066_s4 + $0x90] sm:$0xff]  ;;  %461 = vmatpush.msra.mxu3 %v413_v21  ;;  %v367_v26 = vld [vmem:[%s1066_s4 + $0x180] sm:$0xff]  ;;  %v414_v62 = vld [vmem:[%s1066_s4 + $0x2f8] sm:$0xff] }
  0x16   : > { %292 = vmatpush.msra.mxu0 %v277_v11  ;;  %425 = vmatpush.msra.mxu1 %v341_v16  ;;  %v273_v25 = vld [vmem:[%s1064_s2 + $0x30] sm:$0xff]  ;;  %v335_v27 = vld [vmem:[%s1066_s4 + $0x80] sm:$0xff]  ;;  %v344_v0 = vld [vmem:[%s1066_s4 + $0xc8] sm:$0xff] }
  0x17   : > { %446 = vmatpush.msra.mxu2 %v371_v18  ;;  %462 = vmatpush.msra.mxu3 %v411_v24  ;;  %v409_v28 = vld [vmem:[%s1066_s4 + $0x2d0] sm:$0xff]  ;;  %v407_v30 = vld [vmem:[%s1066_s4 + $0x2c0] sm:$0xff]  ;;  %v382_v1 = vld [vmem:[%s1066_s4 + $0x1f8] sm:$0xff] }
  0x18   : > { %293 = vmatpush.msra.mxu0 %v276_v14  ;;  %426 = vmatpush.msra.mxu1 %v339_v19  ;;  %v365_v31 = vld [vmem:[%s1066_s4 + $0x170] sm:$0xff]  ;;  %v271_v33 = vld [vmem:[%s1064_s2 + $0x20] sm:$0xff]  ;;  %v412_v2 = vld [vmem:[%s1066_s4 + $0x2e8] sm:$0xff] }
  0x19   : > { %447 = vmatpush.msra.mxu2 %v369_v22  ;;  %v333_v32 = vld [vmem:[%s1066_s4 + $0x70] sm:$0xff]  ;;  %463 = vmatpush.msra.mxu3 %v409_v28  ;;  %v363_v35 = vld [vmem:[%s1066_s4 + $0x160] sm:$0xff]  ;;  %v342_v3 = vld [vmem:[%s1066_s4 + $0xb8] sm:$0xff] }
  0x1a   : > { %294 = vmatpush.msra.mxu0 %v275_v17  ;;  %427 = vmatpush.msra.mxu1 %v337_v23  ;;  %v405_v34 = vld [vmem:[%s1066_s4 + $0x2b0] sm:$0xff]  ;;  %v331_v36 = vld [vmem:[%s1066_s4 + $0x60] sm:$0xff]  ;;  %v380_v4 = vld [vmem:[%s1066_s4 + $0x1e8] sm:$0xff] }
  0x1b   : > { %448 = vmatpush.msra.mxu2 %v367_v26  ;;  %464 = vmatpush.msra.mxu3 %v407_v30  ;;  %v403_v38 = vld [vmem:[%s1066_s4 + $0x2a0] sm:$0xff]  ;;  %v361_v39 = vld [vmem:[%s1066_s4 + $0x150] sm:$0xff]  ;;  %v410_v5 = vld [vmem:[%s1066_s4 + $0x2d8] sm:$0xff] }
  0x1c   : > { %295 = vmatpush.msra.mxu0 %v274_v20  ;;  %428 = vmatpush.msra.mxu1 %v335_v27  ;;  %v329_v40 = vld [vmem:[%s1066_s4 + $0x50] sm:$0xff]  ;;  %v359_v43 = vld [vmem:[%s1066_s4 + $0x140] sm:$0xff]  ;;  %v340_v6 = vld [vmem:[%s1066_s4 + $0xa8] sm:$0xff] }
  0x1d   : > { %449 = vmatpush.msra.mxu2 %v365_v31  ;;  %465 = vmatpush.msra.mxu3 %v405_v34  ;;  %v269_v41 = vld [vmem:[%s1064_s2 + $0x10] sm:$0xff]  ;;  %v327_v44 = vld [vmem:[%s1066_s4 + $0x40] sm:$0xff]  ;;  %v378_v7 = vld [vmem:[%s1066_s4 + $0x1d8] sm:$0xff] }
  0x1e   : > { %296 = vmatpush.msra.mxu0 %v273_v25  ;;  %429 = vmatpush.msra.mxu1 %v333_v32  ;;  %v401_v42 = vld [vmem:[%s1066_s4 + $0x290] sm:$0xff]  ;;  %v399_v46 = vld [vmem:[%s1066_s4 + $0x280] sm:$0xff]  ;;  %v408_v8 = vld [vmem:[%s1066_s4 + $0x2c8] sm:$0xff] }
  0x1f   : > { %450 = vmatpush.msra.mxu2 %v363_v35  ;;  %466 = vmatpush.msra.mxu3 %v403_v38  ;;  %v357_v47 = vld [vmem:[%s1066_s4 + $0x130] sm:$0xff]  ;;  %v267_v49 = vld [vmem:[%s1064_s2] sm:$0xff]  ;;  %v338_v9 = vld [vmem:[%s1066_s4 + $0x98] sm:$0xff] }
  0x20   : > { %297 = vmatpush.msra.mxu0 %v272_v29  ;;  %430 = vmatpush.msra.mxu1 %v331_v36  ;;  %v325_v48 = vld [vmem:[%s1066_s4 + $0x30] sm:$0xff]  ;;  %v266_v51 = vld [vmem:[%s256_s7] sm:$0xff]  ;;  %v376_v10 = vld [vmem:[%s1066_s4 + $0x1c8] sm:$0xff] }
  0x21   : > { %451 = vmatpush.msra.mxu2 %v361_v39  ;;  %467 = vmatpush.msra.mxu3 %v401_v42  ;;  %v397_v50 = vld [vmem:[%s1066_s4 + $0x270] sm:$0xff]  ;;  %v355_v52 = vld [vmem:[%s1066_s4 + $0x120] sm:$0xff]  ;;  %v406_v11 = vld [vmem:[%s1066_s4 + $0x2b8] sm:$0xff] }
  0x22   : > { %298 = vmatpush.msra.mxu0 %v271_v33  ;;  %431 = vmatpush.msra.mxu1 %v329_v40  ;;  %v323_v54 = vld [vmem:[%s1066_s4 + $0x20] sm:$0xff]  ;;  %v353_v55 = vld [vmem:[%s1066_s4 + $0x110] sm:$0xff]  ;;  %v336_v12 = vld [vmem:[%s1066_s4 + $0x88] sm:$0xff] }
  0x23   : > { %452 = vmatpush.msra.mxu2 %v359_v43  ;;  %468 = vmatpush.msra.mxu3 %v399_v46  ;;  %v395_v56 = vld [vmem:[%s1066_s4 + $0x260] sm:$0xff]  ;;  %v321_v58 = vld [vmem:[%s1066_s4 + $0x10] sm:$0xff]  ;;  %v374_v13 = vld [vmem:[%s1066_s4 + $0x1b8] sm:$0xff] }
  0x24   : > { %299 = vmatpush.msra.mxu0 %v270_v37  ;;  %432 = vmatpush.msra.mxu1 %v327_v44  ;;  %v351_v59 = vld [vmem:[%s1066_s4 + $0x100] sm:$0xff]  ;;  %v393_v60 = vld [vmem:[%s1066_s4 + $0x250] sm:$0xff]  ;;  %v404_v14 = vld [vmem:[%s1066_s4 + $0x2a8] sm:$0xff] }
  0x25   : > { %453 = vmatpush.msra.mxu2 %v357_v47  ;;  %469 = vmatpush.msra.mxu3 %v397_v50  ;;  %v319_v63 = vld [vmem:[%s1066_s4] sm:$0xff]  ;;  %v334_v15 = vld [vmem:[%s1066_s4 + $0x78] sm:$0xff]  ;;  %v372_v16 = vld [vmem:[%s1066_s4 + $0x1a8] sm:$0xff] }
  0x26   : > { %300 = vmatpush.msra.mxu0 %v269_v41  ;;  %433 = vmatpush.msra.mxu1 %v325_v48  ;;  %v402_v17 = vld [vmem:[%s1066_s4 + $0x298] sm:$0xff]  ;;  %v332_v18 = vld [vmem:[%s1066_s4 + $0x68] sm:$0xff]  ;;  %v391_v22 = vld [vmem:[%s1066_s4 + $0x240] sm:$0xff] }
  0x27   : > { %454 = vmatpush.msra.mxu2 %v355_v52  ;;  %470 = vmatpush.msra.mxu3 %v395_v56  ;;  %v370_v19 = vld [vmem:[%s1066_s4 + $0x198] sm:$0xff]  ;;  %v400_v20 = vld [vmem:[%s1066_s4 + $0x288] sm:$0xff]  ;;  %v389_v26 = vld [vmem:[%s1066_s4 + $0x230] sm:$0xff] }
  0x28   : > { %301 = vmatpush.msra.mxu0 %v268_v45  ;;  %434 = vmatpush.msra.mxu1 %v323_v54  ;;  %v330_v21 = vld [vmem:[%s1066_s4 + $0x58] sm:$0xff]  ;;  %v328_v23 = vld [vmem:[%s1066_s4 + $0x48] sm:$0xff]  ;;  %v387_v30 = vld [vmem:[%s1066_s4 + $0x220] sm:$0xff] }
  0x29   : > { %455 = vmatpush.msra.mxu2 %v353_v55  ;;  %471 = vmatpush.msra.mxu3 %v393_v60  ;;  %v368_v24 = vld [vmem:[%s1066_s4 + $0x188] sm:$0xff]  ;;  %v398_v25 = vld [vmem:[%s1066_s4 + $0x278] sm:$0xff]  ;;  %v385_v34 = vld [vmem:[%s1066_s4 + $0x210] sm:$0xff] }
  0x2a   : > { %302 = vmatpush.msra.mxu0 %v267_v49  ;;  %435 = vmatpush.msra.mxu1 %v321_v58  ;;  %v326_v27 = vld [vmem:[%s1066_s4 + $0x38] sm:$0xff]  ;;  %v396_v29 = vld [vmem:[%s1066_s4 + $0x268] sm:$0xff]  ;;  %v383_v38 = vld [vmem:[%s1066_s4 + $0x200] sm:$0xff] }
  0x2b   : > { %303 = vmatmul.f32.vlgmr.msra.gmra.mxu0 %v266_v51  ;;  %456 = vmatpush.msra.mxu2 %v351_v59  ;;  %v366_v28 = vld [vmem:[%s1066_s4 + $0x178] sm:$0xff]  ;;  %v324_v31 = vld [vmem:[%s1066_s4 + $0x28] sm:$0xff]  ;;  %v638_v49 = vld [vmem:[%s1065_s3] ss:$0 sm:$0xff] }
  0x2c   : > { %481 = vmatpush.msrb.mxu0 %v350_v53  ;;  %436 = vmatpush.msra.mxu1 %v319_v63  ;;  %v364_v32 = vld [vmem:[%s1066_s4 + $0x168] sm:$0xff]  ;;  %v394_v33 = vld [vmem:[%s1066_s4 + $0x258] sm:$0xff]  ;;  %v308_v52 = vld [vmem:[%s260_s19] sm:$0xff] }
  0x2d   : > { %521 = vmatpush.msrb.mxu2 %v414_v62  ;;  %472 = vmatpush.msra.mxu3 %v391_v22  ;;  %v322_v35 = vld [vmem:[%s1066_s4 + $0x18] sm:$0xff]  ;;  %v392_v37 = vld [vmem:[%s1066_s4 + $0x248] sm:$0xff]  ;;  %vm621_vm1 = vmneg %vm313_vm0 }
  0x2e   : > { %482 = vmatpush.msrb.mxu0 %v348_v57  ;;  %501 = vmatpush.msrb.mxu1 %v382_v1  ;;  %v362_v36 = vld [vmem:[%s1066_s4 + $0x158] sm:$0xff]  ;;  %v320_v39 = vld [vmem:[%s1066_s4 + $0x8] sm:$0xff]  ;;  %v415_v57 = vld [vmem:[%s1067_s5] sm:$0x3] }
  0x2f   : > { %522 = vmatpush.msrb.mxu2 %v412_v2  ;;  %473 = vmatpush.msra.mxu3 %v389_v26  ;;  %v360_v40 = vld [vmem:[%s1066_s4 + $0x148] sm:$0xff]  ;;  %v390_v41 = vld [vmem:[%s1066_s4 + $0x238] sm:$0xff]  ;;  %v417_v58 = vperm.slane %v415_v57, 0  ;;  %v418_v62 = vperm.slane %v415_v57, 1 }
  0x30   : > { %483 = vmatpush.msrb.mxu0 %v346_v61  ;;  %502 = vmatpush.msrb.mxu1 %v380_v4  ;;  %v358_v42 = vld [vmem:[%s1066_s4 + $0x138] sm:$0xff]  ;;  %v388_v43 = vld [vmem:[%s1066_s4 + $0x228] sm:$0xff] }
  0x31   : > { %523 = vmatpush.msrb.mxu2 %v410_v5  ;;  %474 = vmatpush.msra.mxu3 %v387_v30  ;;  %v356_v44 = vld [vmem:[%s1066_s4 + $0x128] sm:$0xff]  ;;  %v386_v45 = vld [vmem:[%s1066_s4 + $0x218] sm:$0xff] }
  0x32   : > { %484 = vmatpush.msrb.mxu0 %v344_v0  ;;  %503 = vmatpush.msrb.mxu1 %v378_v7  ;;  %v354_v46 = vld [vmem:[%s1066_s4 + $0x118] sm:$0xff]  ;;  %v384_v47 = vld [vmem:[%s1066_s4 + $0x208] sm:$0xff] }
  0x33   : > { %524 = vmatpush.msrb.mxu2 %v408_v8  ;;  %475 = vmatpush.msra.mxu3 %v385_v34  ;;  %v352_v48 = vld [vmem:[%s1066_s4 + $0x108] sm:$0xff] }
  0x34   : > { %485 = vmatpush.msrb.mxu0 %v342_v3  ;;  %504 = vmatpush.msrb.mxu1 %v376_v10 }
  0x35   : > { %525 = vmatpush.msrb.mxu2 %v406_v11  ;;  %476 = vmatpush.msra.mxu3 %v383_v38 }
  0x36   : > { %486 = vmatpush.msrb.mxu0 %v340_v6  ;;  %505 = vmatpush.msrb.mxu1 %v374_v13 }
  0x37   : > { %526 = vmatpush.msrb.mxu2 %v404_v14 }
  0x38   : > { %487 = vmatpush.msrb.mxu0 %v338_v9  ;;  %506 = vmatpush.msrb.mxu1 %v372_v16 }
  0x39   : > { %527 = vmatpush.msrb.mxu2 %v402_v17 }
  0x3a   : > { %488 = vmatpush.msrb.mxu0 %v336_v12  ;;  %507 = vmatpush.msrb.mxu1 %v370_v19 }
  0x3b   : > { %528 = vmatpush.msrb.mxu2 %v400_v20 }
  0x3c   : > { %489 = vmatpush.msrb.mxu0 %v334_v15  ;;  %508 = vmatpush.msrb.mxu1 %v368_v24 }
  0x3d   : > { %529 = vmatpush.msrb.mxu2 %v398_v25 }
  0x3e   : > { %490 = vmatpush.msrb.mxu0 %v332_v18  ;;  %509 = vmatpush.msrb.mxu1 %v366_v28 }
  0x3f   : > { %530 = vmatpush.msrb.mxu2 %v396_v29 }
  0x40   : > { %491 = vmatpush.msrb.mxu0 %v330_v21  ;;  %510 = vmatpush.msrb.mxu1 %v364_v32 }
  0x41   : > { %531 = vmatpush.msrb.mxu2 %v394_v33 }
  0x42   : > { %492 = vmatpush.msrb.mxu0 %v328_v23  ;;  %511 = vmatpush.msrb.mxu1 %v362_v36 }
  0x43   : > { %532 = vmatpush.msrb.mxu2 %v392_v37 }
  0x44   : > { %493 = vmatpush.msrb.mxu0 %v326_v27  ;;  %512 = vmatpush.msrb.mxu1 %v360_v40 }
  0x45   : > { %533 = vmatpush.msrb.mxu2 %v390_v41 }
  0x46   : > { %494 = vmatpush.msrb.mxu0 %v324_v31  ;;  %513 = vmatpush.msrb.mxu1 %v358_v42 }
  0x47   : > { %534 = vmatpush.msrb.mxu2 %v388_v43 }
  0x48   : > { %495 = vmatpush.msrb.mxu0 %v322_v35  ;;  %514 = vmatpush.msrb.mxu1 %v356_v44 }
  0x49   : > { %535 = vmatpush.msrb.mxu2 %v386_v45 }
  0x4a   : > { %496 = vmatpush.msrb.mxu0 %v320_v39  ;;  %515 = vmatpush.msrb.mxu1 %v354_v46 }
  0x4b   : > { %536 = vmatpush.msrb.mxu2 %v384_v47 }
  0x4c   : > { %516 = vmatpush.msrb.mxu1 %v352_v48 }
  0xa8   : > { %v304_v50 = vpop.f32.mrf.mxu0 }
  0xa9   : > { %v305_v51 = vadd.f32 %v638_v49, %v304_v50 }
  0xab   : > { %v307_v53 = vmax.f32 %v305_v51, 0.0 }
  0xad   : > { %v309_v54 = vadd.f32 %v308_v52, %v307_v53 }
  0xaf   : > { %457 = vmatmul.f32.vlgmr.msra.gmra.mxu2 %v309_v54  ;;  %v311_v55 = vrot.slane %v309_v54, 7  ;;  %v315_v56 = vrot.slane %v309_v54, 1 }
  0xb1   : > { %622 = vmatmul.msk.f32.vlgmr.msra.gmra.mxu1 %vm621_vm1, %v311_v55  ;;  %623 = vmatmul.msk.f32.vlgmr.msra.gmra.mxu3 %vm317_vm2, %v315_v56 }
  0xb2   : > { %625 = vmatmul.msk.f32.vlgmr.msrb.gmra.mxu0 %vm621_vm1, %v311_v55 }
  0xb7   : > { %626 = vmatmul.msk.f32.vlgmr.msrb.gmra.mxu2 %vm317_vm2, %v315_v56 }
  0xb9   : > { %517 = vmatmul.f32.vlgmr.msrb.gmra.mxu1 %v309_v54 }
 0x12e   : > { %v438_v59 = vpop.f32.mrf.mxu1 }
 0x12f   : > { %v439_v60 = vadd.f32 %v438_v59, %v417_v58  ;;  %v498_v0 = vpop.f32.mrf.mxu0 }
 0x130   : > { %v499_v4 = vadd.f32 %v498_v0, %v418_v62 }
 0x132   : > { %v458_v61 = vpop.f32.mrf.mxu2 }
 0x133   : > { %v459_v63 = vadd.f32 %v458_v61, %v439_v60 }
 0x134   : > { %v478_v1 = vpop.f32.mrf.mxu3 }
 0x135   : > { %v479_v2 = vadd.f32 %v478_v1, %v459_v63 }
 0x136   : > { %v518_v3 = vpop.f32.mrf.mxu1 }
 0x137   : > { %v541_v5 = vmax.f32 %v479_v2, 0.0  ;;  %v519_v6 = vadd.f32 %v518_v3, %v499_v4 }
 0x139   : > { %543 = vst [vmem:[%s265_s27] sm:$0xff] %v541_v5 }
 0x13a   : > { %v538_v7 = vpop.f32.mrf.mxu2 }
 0x13b   : > { %v539_v8 = vadd.f32 %v538_v7, %v519_v6 }
 0x13d   : > { %v542_v9 = vmax.f32 %v539_v8, 0.0 }
 0x13f   : > { %544 = vst [vmem:[%s265_s27 + $0x8] sm:$0xff] %v542_v9 }
 0x140 PF: > { %s16_s21 = sadd.s32 1, %s645_s21  }
 0x141   : > { %p13_p4 = scmp.ge.s32.totalorder %s16_s21, 4  }
 0x143   :  { %15 = sbr.rel (!%p13_p4) target bundleno = 1 (0x1), region = 77 }

</bundles_post_ra>
